<compile_context>
chip_gen: v5e
topology: v5e:2x2
jax: 0.10.0
libtpu: 0.0.40
codegen_flags: <defaults>
</compile_context>

<pallas_src>
import functools

import jax
import jax.numpy as jnp
from jax.experimental import pallas as pl
from jax.experimental.pallas import tpu as pltpu

LANE = 128
_SUBLANE_MULTIPLE = 32            # legal sublane multiple for f32/bf16/int8 blocks
_SINGLE_BLOCK_MAX_ROWS = 512      # <= 256 KiB f32: one full-array block is fine
_VMEM_LIMIT_BYTES = 32 * 1024 * 1024
# ~4 MiB of data per block, scaled by element size.
_TARGET_ROWS_BY_ITEMSIZE = {8: 4096, 4: 8192, 2: 16384, 1: 32768}


def _row_axis_semantics():
  """Grid-axis semantics for the row axis.

  On dual-TensorCore chips (v7x) request core-parallel sharding so both cores'
  DMA/issue capacity is used; on single-TC chips (v5e/v6e) plain "parallel" is
  equivalent, and megacore chips (v4/v5p) already shard "parallel" axes.
  """
  try:
    kind = jax.devices()[0].device_kind.lower()
  except Exception:  # pragma: no cover - defensive
    return "parallel"
  if "v7" in kind or "7x" in kind:
    return getattr(pltpu, "CORE_PARALLEL", "parallel")
  return "parallel"


def _make_tqt_kernel(domain: float, method: int):
  quant_max = domain - 1.0
  quant_min = -domain

  def kernel(scales_ref, x_ref, o_ref):
    # scales_ref (SMEM, f32[2]) = [scale, inv_scale], precomputed in the wrapper.
    scale = scales_ref[0]
    inv_scale = scales_ref[1]

    x = x_ref[...].astype(jnp.float32)
    t = x * inv_scale
    if method == 2:
      # DPU rounding: floor(t + 0.5)
      r = jnp.floor(t + 0.5)
    else:
      # method 3: round half away from zero
      r = jnp.where(t >= 0.0, jnp.floor(t + 0.5), jnp.ceil(t - 0.5))
    r = jnp.clip(r, quant_min, quant_max)
    o_ref[...] = (r * scale).astype(o_ref.dtype)

  return kernel


def _fake_quant_xla(x, scale, inv_scale, domain, method):
  """Same formula in plain XLA; used only for the < 128-element unaligned tail."""
  t = x.astype(jnp.float32) * inv_scale
  if method == 2:
    r = jnp.floor(t + 0.5)
  else:
    r = jnp.where(t >= 0.0, jnp.floor(t + 0.5), jnp.ceil(t - 0.5))
  r = jnp.clip(r, -domain, domain - 1.0)
  return (r * scale).astype(x.dtype)


def _quantize_slab(x2, scales, *, domain, method, in_place):
  """Run the elementwise fake-quant kernel over a lane-dense (rows, 128) slab."""
  rows, lane = x2.shape
  assert lane == LANE
  itemsize = jnp.dtype(x2.dtype).itemsize
  target_rows = _TARGET_ROWS_BY_ITEMSIZE.get(itemsize, 8192)

  if rows <= _SINGLE_BLOCK_MAX_ROWS:
    # Tiny tensor: one block covering the whole array (block == full dims is legal
    # regardless of row alignment).
    block_rows = rows
    grid = (1,)
  else:
    # >= 4 pipeline steps so input prefetch / compute / output writeback overlap,
    # capped at the ~4 MiB dtype-scaled target block. Round to a 32-row multiple so
    # the block is legal for f32/bf16/int8 packing alike; the partial last block is
    # handled by Pallas.
    quarter = -(-rows // 4)
    quarter = -(-quarter // _SUBLANE_MULTIPLE) * _SUBLANE_MULTIPLE
    block_rows = min(target_rows, quarter)
    grid = (pl.cdiv(rows, block_rows),)

  extra = {}
  if in_place:
    # Alias the x slab (input index 1; index 0 is the SMEM scales) to the output.
    # Only a real win when the caller donates x; otherwise XLA inserts a copy.
    extra["input_output_aliases"] = {1: 0}

  return pl.pallas_call(
      _make_tqt_kernel(domain, method),
      out_shape=jax.ShapeDtypeStruct((rows, LANE), x2.dtype),
      grid_spec=pltpu.PrefetchScalarGridSpec(
          num_scalar_prefetch=0,
          grid=grid,
          in_specs=[
              pl.BlockSpec(memory_space=pltpu.MemorySpace.SMEM),   # [scale, inv_scale]
              pl.BlockSpec((block_rows, LANE), lambda i: (i, 0)),  # x tile
          ],
          out_specs=pl.BlockSpec((block_rows, LANE), lambda i: (i, 0)),
      ),
      compiler_params=pltpu.CompilerParams(
          dimension_semantics=(_row_axis_semantics(),),
          # 4 MiB blocks x (in + out) x double-buffered = ~16 MiB; 32 MiB limit is
          # safe on v5e/v6e (128 MiB VMEM) and v7x (64 MiB physical, 32 MiB default).
          vmem_limit_bytes=_VMEM_LIMIT_BYTES,
      ),
      **extra,
  )(scales, x2)


@functools.partial(jax.jit, static_argnames=("bitwidth", "method", "in_place"))
def tqt_quantize(x, log_threshold, *, bitwidth: int, method: int, in_place: bool = False):
  """Elementwise TQT fake-quantization; hot path in Pallas.

  `in_place=True` aliases the input slab to the output (combine with buffer
  donation of `x` for an actual in-place update).
  """
  domain = float(2 ** (bitwidth - 1))
  orig_shape = x.shape
  orig_dtype = x.dtype

  # Scalar scale computation hoisted out of the kernel (passed via SMEM).
  # NOTE: assumes a per-tensor scalar threshold (the PyTorch module uses a single
  # log_threshold parameter of shape [1]).
  logt = log_threshold.astype(jnp.float32).reshape(-1)[0]
  ceil_logt = jnp.ceil(logt)
  scale = jnp.exp2(ceil_logt) / domain           # 2^ceil(logt) / 2^(b-1)
  inv_scale = domain * jnp.exp2(-ceil_logt)      # exact power-of-2 reciprocal
  scales = jnp.stack([scale, inv_scale])

  flat = x.reshape(-1)
  n = flat.shape[0]

  if n % LANE == 0:
    # Aligned fast path: no pad, no tail, no post-slice -> no wrapper-side copies.
    rows = n // LANE
    out2 = _quantize_slab(flat.reshape(rows, LANE), scales,
                          domain=domain, method=method, in_place=in_place)
    return out2.reshape(orig_shape)

  # Unaligned path: stream the 128-aligned bulk through the kernel; handle the
  # < 128-element tail with plain XLA (no full-tensor pad / post-slice).
  bulk = (n // LANE) * LANE
  parts = []
  if bulk > 0:
    bulk2 = flat[:bulk].reshape(bulk // LANE, LANE)
    bulk_out = _quantize_slab(bulk2, scales,
                              domain=domain, method=method, in_place=in_place)
    parts.append(bulk_out.reshape(-1))
  tail_out = _fake_quant_xla(flat[bulk:], scale, inv_scale, domain, method)
  parts.append(tail_out)
  out_flat = parts[0] if len(parts) == 1 else jnp.concatenate(parts, axis=0)
  return out_flat.reshape(orig_shape).astype(orig_dtype)


class TQTQuantizer:
  """JAX/Pallas port of pytorch_nndct TQTQuantizer (forward only)."""

  def __init__(self, bitwidth: int, tensor_type: str):
    if tensor_type not in ("weight", "act"):
      raise ValueError("'tensor_type' must be one of ['weight', 'act']")
    if bitwidth > 24:
      # f32 round/clip path loses integer exactness past 2^24.
      raise ValueError("bitwidth > 24 not supported by the f32 fake-quant path")
    self.bitwidth = bitwidth
    self.tensor_type = tensor_type
    self.method = 3 if tensor_type == "weight" else 2
    self.domain = float(2 ** (bitwidth - 1))
    # nn.Parameter(torch.tensor([0.0]))
    self.log_threshold = jnp.zeros((1,), jnp.float32)
    self.quant_enabled = True
    self.warmup_enabled = True

  def _init_threshold(self, x):
    """Table 2 of https://arxiv.org/pdf/1903.08066.pdf (one-time init)."""
    xf = x.astype(jnp.float32)
    if self.tensor_type == "weight":
      # _3sd: |mean(x + 1e-6)| + 3 * std(x)
      th = jnp.abs(jnp.mean(xf + 1e-6)) + 3.0 * jnp.std(xf)
    else:
      # TODO(synk): the KL-J histogram search (_kl_j) is host-side numpy with
      # data-dependent histogram bins; no clean Pallas equivalent. Fallback: max|x|.
      th = jnp.max(jnp.abs(xf))
    return jnp.reshape(th, (1,))

  def __call__(self, x):
    if not self.quant_enabled:
      return x
    if self.warmup_enabled:
      self.warmup_enabled = False
      threshold = self._init_threshold(x)
      self.log_threshold = jnp.log2(threshold).astype(jnp.float32)
    return tqt_quantize(x, self.log_threshold,
                        bitwidth=self.bitwidth, method=self.method)


def _reference(x, log_threshold, bitwidth, method):
  """Pure-JAX reference for correctness check."""
  domain = float(2 ** (bitwidth - 1))
  scale = jnp.exp2(jnp.ceil(log_threshold[0])) / domain
  t = x.astype(jnp.float32) / scale
  if method == 2:
    r = jnp.floor(t + 0.5)
  else:
    r = jnp.where(t >= 0.0, jnp.floor(t + 0.5), jnp.ceil(t - 0.5))
  r = jnp.clip(r, -domain, domain - 1.0)
  return (r * scale).astype(x.dtype)


if __name__ == "__main__":
  key = jax.random.PRNGKey(0)
  kw, ka, kb, kc = jax.random.split(key, 4)

  # weight (144 elems)     -> unaligned: 1-row kernel bulk + 16-element XLA tail
  # small act (2048 elems) -> aligned, single full-array block
  # big act (512K elems)   -> aligned, 4-step pipelined grid (block 1024x128)
  # bf16 act (512K elems)  -> exercises dtype-scaled block sizing / bf16 output cast
  w = jax.random.normal(kw, (4, 4, 3, 3), dtype=jnp.float32) * 0.5
  x = jax.random.normal(ka, (2, 4, 16, 16), dtype=jnp.float32) * 2.0     # layout: NCHW
  xb = jax.random.normal(kb, (8, 64, 32, 32), dtype=jnp.float32) * 2.0   # layout: NCHW
  xh = (jax.random.normal(kc, (4, 128, 32, 32), dtype=jnp.float32) * 2.0).astype(jnp.bfloat16)

  wq_mod = TQTQuantizer(bitwidth=8, tensor_type="weight")
  aq_mod = TQTQuantizer(bitwidth=8, tensor_type="act")
  bq_mod = TQTQuantizer(bitwidth=8, tensor_type="act")
  hq_mod = TQTQuantizer(bitwidth=8, tensor_type="act")

  wq = wq_mod(w)
  aq = aq_mod(x)
  bq = bq_mod(xb)
  hq = hq_mod(xh)
  # In-place variant (aliased output). Callers should donate x for a real win;
  # here it is only exercised for correctness.
  bq_inplace = tqt_quantize(xb, bq_mod.log_threshold, bitwidth=8, method=2, in_place=True)
  jax.block_until_ready((wq, aq, bq, hq, bq_inplace))

  # Sanity: kernel matches pure-JAX reference.
  wq_ref = _reference(w, wq_mod.log_threshold, 8, wq_mod.method)
  aq_ref = _reference(x, aq_mod.log_threshold, 8, aq_mod.method)
  bq_ref = _reference(xb, bq_mod.log_threshold, 8, bq_mod.method)
  hq_ref = _reference(xh, hq_mod.log_threshold, 8, hq_mod.method)

  assert wq.shape == w.shape and aq.shape == x.shape
  assert bq.shape == xb.shape and hq.shape == xh.shape
  assert jnp.allclose(wq, wq_ref, atol=1e-6), "weight quantization mismatch"
  assert jnp.allclose(aq, aq_ref, atol=1e-6), "activation quantization mismatch"
  assert jnp.allclose(bq, bq_ref, atol=1e-6), "large activation quantization mismatch"
  assert jnp.allclose(bq_inplace, bq_ref, atol=1e-6), "in-place quantization mismatch"
  assert jnp.allclose(hq.astype(jnp.float32), hq_ref.astype(jnp.float32), atol=1e-2), \
      "bf16 activation quantization mismatch"

  print("KERNEL_OK")
</pallas_src>

<mosaic_0001>
module attributes {stable_mosaic.version = 11 : i64} {
  func.func @kernel(%arg0: i32, %arg1: memref<2xf32, #tpu.memory_space<smem>>, %arg2: memref<1x128xf32, #tpu.memory_space<vmem>>, %arg3: memref<1x128xf32, #tpu.memory_space<vmem>>) attributes {dimension_semantics = [#tpu.dimension_semantics<parallel>], iteration_bounds = array<i64: 1>, scalar_prefetch = 0 : i64, scratch_operands = 0 : i64, tpu.core_type = #tpu.core_type<tc>, window_params = [{transform_indices = @transform_0, window_bounds = array<i64: 2>}, {transform_indices = @transform_1, window_bounds = array<i64: 1, 128>}, {transform_indices = @transform_2, window_bounds = array<i64: 1, 128>}]} {
    %c0 = arith.constant 0 : index
    %0 = memref.load %arg1[%c0] : memref<2xf32, #tpu.memory_space<smem>>
    %c1 = arith.constant 1 : index
    %1 = memref.load %arg1[%c1] : memref<2xf32, #tpu.memory_space<smem>>
    %c0_0 = arith.constant 0 : index
    %c0_1 = arith.constant 0 : index
    %2 = vector.load %arg2[%c0_0, %c0_1] : memref<1x128xf32, #tpu.memory_space<vmem>>, vector<1x128xf32>
    %3 = vector.broadcast %1 : f32 to vector<1x128xf32>
    %4 = arith.mulf %2, %3 : vector<1x128xf32>
    %cst = arith.constant 0.000000e+00 : f32
    %5 = vector.broadcast %cst : f32 to vector<1x128xf32>
    %6 = arith.cmpf oge, %4, %5 : vector<1x128xf32>
    %cst_2 = arith.constant 5.000000e-01 : f32
    %7 = vector.broadcast %cst_2 : f32 to vector<1x128xf32>
    %8 = arith.addf %4, %7 : vector<1x128xf32>
    %9 = math.floor %8 : vector<1x128xf32>
    %cst_3 = arith.constant 5.000000e-01 : f32
    %10 = vector.broadcast %cst_3 : f32 to vector<1x128xf32>
    %11 = arith.subf %4, %10 : vector<1x128xf32>
    %12 = math.ceil %11 : vector<1x128xf32>
    %13 = arith.select %6, %9, %12 : vector<1x128xi1>, vector<1x128xf32>
    %cst_4 = arith.constant -1.280000e+02 : f32
    %cst_5 = arith.constant 1.270000e+02 : f32
    %14 = vector.broadcast %cst_4 : f32 to vector<1x128xf32>
    %15 = arith.maximumf %14, %13 : vector<1x128xf32>
    %16 = vector.broadcast %cst_5 : f32 to vector<1x128xf32>
    %17 = arith.minimumf %16, %15 : vector<1x128xf32>
    %18 = vector.broadcast %0 : f32 to vector<1x128xf32>
    %19 = arith.mulf %17, %18 : vector<1x128xf32>
    %c0_6 = arith.constant 0 : index
    %c0_7 = arith.constant 0 : index
    %20 = vector.load %arg3[%c0_6, %c0_7] : memref<1x128xf32, #tpu.memory_space<vmem>>, vector<1x128xf32>
    tpu.vector_store %arg3[%c0_6, %c0_7], %19 {strides = array<i32>} : memref<1x128xf32, #tpu.memory_space<vmem>>, vector<1x128xf32>,
    return
  }
  func.func @transform_0(%arg0: i32) -> i32 {
    %c0_i32 = arith.constant 0 : i32
    %c0_i32_0 = arith.constant 0 : i32
    return %c0_i32 : i32
  }
  func.func @transform_1(%arg0: i32) -> (i32, i32) {
    %c0_i32 = arith.constant 0 : i32
    %c0_i32_0 = arith.constant 0 : i32
    return %arg0, %c0_i32 : i32, i32
  }
  func.func @transform_2(%arg0: i32) -> (i32, i32) {
    %c0_i32 = arith.constant 0 : i32
    %c0_i32_0 = arith.constant 0 : i32
    return %arg0, %c0_i32 : i32, i32
  }
}

</mosaic_0001>

<bundles_post_ra>
// kernel: tqt_quantize.1
= control target key start
LH: loop header
LB: loop body
LE: loop exit
PB: predicated region body
PF: predicated region fallthrough
CT: control target
= control target key end

     0   :  { %7 = vsyncpa [#allocation3], 0  ;;  %s62_s12 = smov [#allocation2]   ;;  %s87_s0 = inlined_call_operand.vmem [shape: f32[2], index: 0, kind: input, shape index: {}]   ;;  %s88_s1 = inlined_call_operand.vmem [shape: f32[1,128], index: 1, kind: input, shape index: {}]   ;;  %s89_s2 = inlined_call_operand.vmem [shape: f32[1,128], index: 2, kind: output, shape index: {}]  }
   0x1   :  { %s13_s11 = sshll.u32 %s87_s0, 4  ;;  %s14_s11 = int_to_ptr.vmem [resolvable:$true] %s13_s11 }
   0x2   :  { %16 = dma.vmem_to_smem %s14_s11, 16, %s62_s12, [#allocation3]  }
   0x3   :  { %60 = dma.done.wait [#allocation3], 16  }
   0x4   :  { %61 = vsyncadd [#allocation3], 4294967280 }
   0x5   :  { %23 = sfence }
   0x6   :  { %s45_s13 = sld [smem:[#allocation2 + $0x1]]  ;;  %v26_v0 = vld [vmem:[%s88_s1] sm:$0x1] }
   0x7   :  { %s24_s16 = sld [smem:[#allocation2]] }
   0xc   :  { %v27_v1 = vstv %s45_s13 }
   0xd   :  { %v28_v2 = vmul.f32 %v27_v1, %v26_v0  ;;  %v37_v9 = vstv %s24_s16 }
   0xf   :  { %v30_v3 = vadd.f32 0.5, %v28_v2  ;;  %v46_v4 = vadd.f32 -0.5, %v28_v2  ;;  %vm29_vm0 = vcmp.ge.f32.partialorder %v28_v2, 0.0 }
  0x11   :  { %v31_v5 = vfloor.f32 %v30_v3  ;;  %v33_v6 = vceil.f32 %v46_v4 }
  0x13   :  { %v34_v7 = vsel %vm29_vm0, %v31_v5, %v33_v6 }
  0x14   :  { %v35_v8 = vmax.f32 %v34_v7, -128.0 }
  0x16   :  { %v36_v10 = vmin.f32 %v35_v8, 127.0 }
  0x18   :  { %v38_v11 = vmul.f32 %v37_v9, %v36_v10 }
  0x1a   :  { %39 = vst [vmem:[%s89_s2] sm:$0x1] %v38_v11 }
  0x1b   :  { %44 = vsyncpa [#allocation3], 1 }

</bundles_post_ra>
